<compile_context>
chip_gen: v7x
topology: tpu7x:2x2x1
jax: 0.10.0
libtpu: 0.0.40
codegen_flags: <defaults>
</compile_context>

<pallas_src>
import functools

import jax
import jax.numpy as jnp
from jax.experimental import pallas as pl
from jax.experimental.pallas import tpu as pltpu

EPS = 1e-5  # PyTorch BatchNorm1d default eps


# ------------------------------ helpers -------------------------------------


def _round_up(v, m):
    return ((v + m - 1) // m) * m


def _vmem_capacity_bytes():
    try:
        return int(pltpu.get_tpu_info().vmem_capacity_bytes)
    except Exception:
        return 64 * 1024 * 1024  # conservative fallback (v7x per-TC VMEM)


def _lane_mask(tile_idx, tl, length):
    """(1, tl) f32 mask of lane positions that are real (not padding)."""
    col = jax.lax.broadcasted_iota(jnp.int32, (1, tl), 1)
    return (col + tile_idx * tl < length).astype(jnp.float32)


# ------------------------- fused single-call kernel -------------------------


def _fused_kernel(x_ref, w1_ref, b1_ref, wh_ref, bh_ref, gamma_ref, beta_ref,
                  wl_ref, bl_ref, o_ref,
                  h_scr, sum_scr, sq_scr, scale_scr, shift_scr,
                  *, n_stages, tiles_per_batch, tl, length, inv_m, needs_mask):
    s = pl.program_id(0)          # stage
    n = pl.program_id(1)          # batch
    t = pl.program_id(2)          # lane tile
    idx = n * tiles_per_batch + t

    lane_mask = _lane_mask(t, tl, length) if needs_mask else None

    # --- stage boundary: fold previous stage's stats into BN scale/shift ----
    @pl.when(jnp.logical_and(n == 0, t == 0))
    def _stage_boundary():
        @pl.when(s > 0)
        def _():
            mean = sum_scr[...] * inv_m
            var = jnp.maximum(sq_scr[...] * inv_m - mean * mean, 0.0)
            scale = gamma_ref[s - 1] * jax.lax.rsqrt(var + EPS)
            scale_scr[...] = scale
            shift_scr[...] = beta_ref[s - 1] - mean * scale
        sum_scr[...] = jnp.zeros_like(sum_scr)
        sq_scr[...] = jnp.zeros_like(sq_scr)

    def _accum(hp):
        if lane_mask is None:
            sum_scr[...] += jnp.sum(hp, axis=1, keepdims=True)
            sq_scr[...] += jnp.sum(hp * hp, axis=1, keepdims=True)
        else:
            sum_scr[...] += jnp.sum(hp * lane_mask, axis=1, keepdims=True)
            sq_scr[...] += jnp.sum(hp * hp * lane_mask, axis=1, keepdims=True)

    # --- stage 0: first_layer -> ReLU -> hidden conv 0 (pre-BN) -------------
    @pl.when(s == 0)
    def _head():
        x = x_ref[...].astype(jnp.float32)
        h = jnp.maximum(
            jnp.dot(w1_ref[...], x, preferred_element_type=jnp.float32)
            + b1_ref[...], 0.0)
        hp = jnp.dot(wh_ref[0], h, preferred_element_type=jnp.float32) + bh_ref[0]
        h_scr[idx] = hp
        _accum(hp)

    # --- middle stages: BN-affine -> ReLU -> next hidden conv ---------------
    if n_stages > 2:
        @pl.when(jnp.logical_and(s > 0, s < n_stages - 1))
        def _mid():
            h = jnp.maximum(h_scr[idx] * scale_scr[...] + shift_scr[...], 0.0)
            hp = jnp.dot(wh_ref[s], h, preferred_element_type=jnp.float32) + bh_ref[s]
            h_scr[idx] = hp
            _accum(hp)

    # --- last stage: BN-affine -> ReLU -> last_layer -------------------------
    @pl.when(s == n_stages - 1)
    def _tail():
        h = jnp.maximum(h_scr[idx] * scale_scr[...] + shift_scr[...], 0.0)
        out = jnp.dot(wl_ref[...], h, preferred_element_type=jnp.float32) + bl_ref[...]
        o_ref[...] = out.astype(o_ref.dtype)


def _fused_call(x, params, *, n_hidden, tl, length, vmem_limit):
    n, cin, lp = x.shape
    d = params["w1"].shape[0]
    cout = params["wl"].shape[0]
    t = lp // tl
    n_stages = n_hidden + 1
    last = n_stages - 1

    kernel = functools.partial(
        _fused_kernel, n_stages=n_stages, tiles_per_batch=t, tl=tl,
        length=length, inv_m=1.0 / float(n * length),
        needs_mask=(lp != length))

    # x only needed in stage 0 / output only written in the last stage:
    # pin their block index elsewhere so no per-stage DMA traffic is wasted.
    x_spec = pl.BlockSpec(
        (None, cin, tl),
        lambda s, nb, lt: (jnp.where(s == 0, nb, 0), 0, jnp.where(s == 0, lt, 0)))
    o_spec = pl.BlockSpec(
        (None, cout, tl),
        lambda s, nb, lt: (jnp.where(s == last, nb, 0), 0,
                           jnp.where(s == last, lt, 0)))

    def const(a):
        return pl.BlockSpec(a.shape, lambda *_: (0,) * a.ndim)

    return pl.pallas_call(
        kernel,
        grid=(n_stages, n, t),
        in_specs=[x_spec,
                  const(params["w1"]), const(params["b1"]),
                  const(params["wh"]), const(params["bh"]),
                  const(params["gamma"]), const(params["beta"]),
                  const(params["wl"]), const(params["bl"])],
        out_specs=o_spec,
        out_shape=jax.ShapeDtypeStruct((n, cout, lp), x.dtype),
        scratch_shapes=[
            pltpu.VMEM((n * t, d, tl), jnp.float32),   # persistent h (whole tensor)
            pltpu.VMEM((d, 1), jnp.float32),           # BN sum accumulator
            pltpu.VMEM((d, 1), jnp.float32),           # BN sum-of-squares accumulator
            pltpu.VMEM((d, 1), jnp.float32),           # BN scale (per stage)
            pltpu.VMEM((d, 1), jnp.float32),           # BN shift (per stage)
        ],
        compiler_params=pltpu.CompilerParams(
            dimension_semantics=("arbitrary", "arbitrary", "arbitrary"),
            vmem_limit_bytes=vmem_limit),
    )(x, params["w1"], params["b1"], params["wh"], params["bh"],
      params["gamma"], params["beta"], params["wl"], params["bl"])


# --------------------- multi-call fallback (h > VMEM) -----------------------


def _accum_stats(hp, sum_ref, sq_ref, lane_mask):
    @pl.when(pl.program_id(1) == 0)
    def _():
        sum_ref[...] = jnp.zeros_like(sum_ref)
        sq_ref[...] = jnp.zeros_like(sq_ref)
    if lane_mask is None:
        sum_ref[...] += jnp.sum(hp, axis=1, keepdims=True)
        sq_ref[...] += jnp.sum(hp * hp, axis=1, keepdims=True)
    else:
        sum_ref[...] += jnp.sum(hp * lane_mask, axis=1, keepdims=True)
        sq_ref[...] += jnp.sum(hp * hp * lane_mask, axis=1, keepdims=True)


def _head_kernel(x_ref, w1_ref, b1_ref, wh_ref, bh_ref,
                 h_out_ref, sum_ref, sq_ref, *, tl, length, needs_mask):
    x = x_ref[...].astype(jnp.float32)
    h = jnp.maximum(
        jnp.dot(w1_ref[...], x, preferred_element_type=jnp.float32) + b1_ref[...],
        0.0)
    hp = jnp.dot(wh_ref[...], h, preferred_element_type=jnp.float32) + bh_ref[...]
    h_out_ref[...] = hp
    mask = _lane_mask(pl.program_id(1), tl, length) if needs_mask else None
    _accum_stats(hp, sum_ref, sq_ref, mask)


def _mid_kernel(h_ref, scale_ref, shift_ref, wh_ref, bh_ref,
                h_out_ref, sum_ref, sq_ref, *, tl, length, needs_mask):
    h = jnp.maximum(h_ref[...] * scale_ref[...] + shift_ref[...], 0.0)
    hp = jnp.dot(wh_ref[...], h, preferred_element_type=jnp.float32) + bh_ref[...]
    h_out_ref[...] = hp
    mask = _lane_mask(pl.program_id(1), tl, length) if needs_mask else None
    _accum_stats(hp, sum_ref, sq_ref, mask)


def _tail_kernel(h_ref, scale_ref, shift_ref, wl_ref, bl_ref, o_ref):
    h = jnp.maximum(h_ref[...] * scale_ref[...] + shift_ref[...], 0.0)
    out = jnp.dot(wl_ref[...], h, preferred_element_type=jnp.float32) + bl_ref[...]
    o_ref[...] = out.astype(o_ref.dtype)


def _tiled_spec(c, tl):
    return pl.BlockSpec((None, c, tl), lambda nb, lt: (nb, 0, lt))


def _const_spec(a):
    return pl.BlockSpec(a.shape, lambda *_: (0,) * a.ndim)


def _stats_spec(d):
    # Per-batch partial sums: block index depends only on the parallel batch
    # axis, so v7x megacore can shard batches with no accumulator races.
    return pl.BlockSpec((None, d, 1), lambda nb, lt: (nb, 0, 0))


def _head_call(x, w1, b1, wh0, bh0, *, tl, length, vmem_limit):
    n, cin, lp = x.shape
    d = w1.shape[0]
    kernel = functools.partial(_head_kernel, tl=tl, length=length,
                               needs_mask=(lp != length))
    return pl.pallas_call(
        kernel, grid=(n, lp // tl),
        in_specs=[_tiled_spec(cin, tl), _const_spec(w1), _const_spec(b1),
                  _const_spec(wh0), _const_spec(bh0)],
        out_specs=(_tiled_spec(d, tl), _stats_spec(d), _stats_spec(d)),
        out_shape=(jax.ShapeDtypeStruct((n, d, lp), jnp.float32),
                   jax.ShapeDtypeStruct((n, d, 1), jnp.float32),
                   jax.ShapeDtypeStruct((n, d, 1), jnp.float32)),
        compiler_params=pltpu.CompilerParams(
            dimension_semantics=("parallel", "arbitrary"),
            vmem_limit_bytes=vmem_limit),
    )(x, w1, b1, wh0, bh0)


def _mid_call(h, scale, shift, wh, bh, *, tl, length, vmem_limit):
    n, d, lp = h.shape
    kernel = functools.partial(_mid_kernel, tl=tl, length=length,
                               needs_mask=(lp != length))
    return pl.pallas_call(
        kernel, grid=(n, lp // tl),
        in_specs=[_tiled_spec(d, tl), _const_spec(scale), _const_spec(shift),
                  _const_spec(wh), _const_spec(bh)],
        out_specs=(_tiled_spec(d, tl), _stats_spec(d), _stats_spec(d)),
        out_shape=(jax.ShapeDtypeStruct((n, d, lp), jnp.float32),
                   jax.ShapeDtypeStruct((n, d, 1), jnp.float32),
                   jax.ShapeDtypeStruct((n, d, 1), jnp.float32)),
        compiler_params=pltpu.CompilerParams(
            dimension_semantics=("parallel", "arbitrary"),
            vmem_limit_bytes=vmem_limit),
    )(h, scale, shift, wh, bh)


def _tail_call(h, scale, shift, wl, bl, *, tl, vmem_limit):
    n, d, lp = h.shape
    cout = wl.shape[0]
    return pl.pallas_call(
        _tail_kernel, grid=(n, lp // tl),
        in_specs=[_tiled_spec(d, tl), _const_spec(scale), _const_spec(shift),
                  _const_spec(wl), _const_spec(bl)],
        out_specs=_tiled_spec(cout, tl),
        out_shape=jax.ShapeDtypeStruct((n, cout, lp), h.dtype),
        compiler_params=pltpu.CompilerParams(
            dimension_semantics=("parallel", "parallel"),
            vmem_limit_bytes=vmem_limit),
    )(h, scale, shift, wl, bl)


def _bn_affine(psum, psq, gamma, beta, m):
    """BN scale/shift from per-batch partial sums; psum/psq: (N, D, 1)."""
    s = jnp.sum(psum, axis=0)[:, 0]
    q = jnp.sum(psq, axis=0)[:, 0]
    mean = s / m
    var = jnp.maximum(q / m - mean * mean, 0.0)   # biased var (train mode)
    scale = gamma[:, 0] * jax.lax.rsqrt(var + EPS)
    shift = beta[:, 0] - mean * scale
    return scale.reshape(-1, 1), shift.reshape(-1, 1)


def _multi_call_forward(x, params, *, n_hidden, tl, length, cap):
    n, _, _ = x.shape
    m = float(n * length)
    vmem_limit = int(min(cap, 64 << 20))
    h, psum, psq = _head_call(x, params["w1"], params["b1"],
                              params["wh"][0], params["bh"][0],
                              tl=tl, length=length, vmem_limit=vmem_limit)
    for i in range(1, n_hidden):
        scale, shift = _bn_affine(psum, psq, params["gamma"][i - 1],
                                  params["beta"][i - 1], m)
        h, psum, psq = _mid_call(h, scale, shift, params["wh"][i], params["bh"][i],
                                 tl=tl, length=length, vmem_limit=vmem_limit)
    scale, shift = _bn_affine(psum, psq, params["gamma"][n_hidden - 1],
                              params["beta"][n_hidden - 1], m)
    return _tail_call(h, scale, shift, params["wl"], params["bl"],
                      tl=tl, vmem_limit=vmem_limit)


# ------------------------------ public wrapper ------------------------------


def denoising_single_orient_forward(x, params, *, n_hidden, max_tile_l=1024,
                                    force_path=None):
    """x: (N, Cin, L) float32.  Matches the PyTorch module forward (k=1)."""
    n, _, length = x.shape
    assert n_hidden >= 1  # TODO(synk): n_hidden == 0 (module n_hidden=1) path.
    d = params["w1"].shape[0]

    # Large lane tiles (multiple of 128); pad L to a tile multiple and mask
    # the BN statistics instead of collapsing to one giant tile.
    tl = min(max_tile_l, _round_up(length, 128))
    lp = _round_up(length, tl)
    if lp != length:
        x = jnp.pad(x, ((0, 0), (0, 0), (0, lp - length)))

    cap = _vmem_capacity_bytes()
    h_bytes = n * lp * d * 4
    needed = h_bytes + 4 * (8 * tl * 4) + (2 << 20)   # h + io blocks + margin
    use_fused = needed <= int(0.7 * cap)
    if force_path == "fused":
        use_fused = True
    elif force_path == "multi":
        use_fused = False

    if use_fused:
        vmem_limit = int(min(cap, needed + (16 << 20)))
        out = _fused_call(x, params, n_hidden=n_hidden, tl=tl,
                          length=length, vmem_limit=vmem_limit)
    else:
        out = _multi_call_forward(x, params, n_hidden=n_hidden, tl=tl,
                                  length=length, cap=cap)

    if lp != length:
        out = out[:, :, :length]
    return out


# ------------------------ params + pure-JAX reference -----------------------


def make_params(key, input_dim, hidden_dim, n_hidden):
    """Deterministic synthetic parameters (shapes match the PyTorch module)."""
    ks = jax.random.split(key, 4)
    w1 = jax.random.normal(ks[0], (hidden_dim, input_dim), jnp.float32) * 0.5
    wh = jax.random.normal(ks[1], (n_hidden, hidden_dim, hidden_dim), jnp.float32) * 0.2
    wl = jax.random.normal(ks[2], (input_dim, hidden_dim), jnp.float32) * 0.2
    b1 = jax.random.normal(ks[3], (hidden_dim,), jnp.float32) * 0.1
    bh = jnp.linspace(-0.1, 0.1, n_hidden * hidden_dim,
                      dtype=jnp.float32).reshape(n_hidden, hidden_dim)
    bl = jnp.full((input_dim,), 0.05, jnp.float32)
    gamma = jnp.ones((n_hidden, hidden_dim), jnp.float32)   # BN default init
    beta = jnp.zeros((n_hidden, hidden_dim), jnp.float32)

    params = dict(
        w1=w1,                                       # (D, Cin)
        b1=b1.reshape(hidden_dim, 1),                # (D, 1)
        wh=wh,                                       # (nh, D, D)
        bh=bh.reshape(n_hidden, hidden_dim, 1),      # (nh, D, 1)
        gamma=gamma.reshape(n_hidden, hidden_dim, 1),
        beta=beta.reshape(n_hidden, hidden_dim, 1),
        wl=wl,                                       # (Cout, D)
        bl=bl.reshape(input_dim, 1),                 # (Cout, 1)
    )
    raw = dict(w1=w1, b1=b1, wh=wh, bh=bh, gamma=gamma, beta=beta, wl=wl, bl=bl)
    return params, raw


def reference_forward(x, raw, *, n_hidden):
    """Pure-JAX reference mirroring the PyTorch module (k=1, BN train mode)."""
    h = jnp.einsum("oc,ncl->nol", raw["w1"], x) + raw["b1"][None, :, None]
    h = jnp.maximum(h, 0.0)
    for i in range(n_hidden):
        h = jnp.einsum("oc,ncl->nol", raw["wh"][i], h) + raw["bh"][i][None, :, None]
        mean = h.mean(axis=(0, 2), keepdims=True)
        var = ((h - mean) ** 2).mean(axis=(0, 2), keepdims=True)
        h = (h - mean) / jnp.sqrt(var + EPS)
        h = h * raw["gamma"][i][None, :, None] + raw["beta"][i][None, :, None]
        h = jnp.maximum(h, 0.0)
    out = jnp.einsum("oc,ncl->nol", raw["wl"], h) + raw["bl"][None, :, None]
    return out


if __name__ == "__main__":
    # Module hyperparameters: kernel_size=1, n_hidden=3 -> 2 hidden conv/BN blocks.
    input_dim = 4
    hidden_dim = 16
    n_hidden_layers = 3 - 1        # self.n_hidden = n_hidden - 1
    batch = 2

    key = jax.random.PRNGKey(0)
    kx, kp = jax.random.split(key)
    params, raw = make_params(kp, input_dim, hidden_dim, n_hidden_layers)

    def run_case(length, force_path):
        x = jax.random.normal(kx, (batch, input_dim, length), jnp.float32)
        fwd = jax.jit(functools.partial(denoising_single_orient_forward,
                                        n_hidden=n_hidden_layers,
                                        force_path=force_path))
        out = jax.block_until_ready(fwd(x, params))
        ref = reference_forward(x, raw, n_hidden=n_hidden_layers)
        assert out.shape == ref.shape, (out.shape, ref.shape)
        max_err = float(jnp.max(jnp.abs(out - ref)))
        assert jnp.allclose(out, ref, atol=1e-4, rtol=1e-4), \
            (force_path, length, max_err)

    run_case(256, None)      # auto path (fused single call, aligned L)
    run_case(200, None)      # fused path with padded L + masked BN stats
    run_case(256, "multi")   # multi-call fallback (h too big for VMEM case)
    run_case(200, "multi")   # fallback with padded L + masked BN stats

    print("KERNEL_OK")
</pallas_src>

<mosaic_0001>
module attributes {stable_mosaic.version = 11 : i64} {
  func.func @_fused_kernel(%arg0: i32, %arg1: i32, %arg2: i32, %arg3: memref<1x4x256xf32, #tpu.memory_space<vmem>>, %arg4: memref<16x4xf32, #tpu.memory_space<vmem>>, %arg5: memref<16x1xf32, #tpu.memory_space<vmem>>, %arg6: memref<2x16x16xf32, #tpu.memory_space<vmem>>, %arg7: memref<2x16x1xf32, #tpu.memory_space<vmem>>, %arg8: memref<2x16x1xf32, #tpu.memory_space<vmem>>, %arg9: memref<2x16x1xf32, #tpu.memory_space<vmem>>, %arg10: memref<4x16xf32, #tpu.memory_space<vmem>>, %arg11: memref<4x1xf32, #tpu.memory_space<vmem>>, %arg12: memref<1x4x256xf32, #tpu.memory_space<vmem>>, %arg13: memref<2x16x256xf32, #tpu.memory_space<vmem>>, %arg14: memref<16x1xf32, #tpu.memory_space<vmem>>, %arg15: memref<16x1xf32, #tpu.memory_space<vmem>>, %arg16: memref<16x1xf32, #tpu.memory_space<vmem>>, %arg17: memref<16x1xf32, #tpu.memory_space<vmem>>) attributes {dimension_semantics = [#tpu.dimension_semantics<arbitrary>, #tpu.dimension_semantics<arbitrary>, #tpu.dimension_semantics<arbitrary>], iteration_bounds = array<i64: 3, 2, 1>, scalar_prefetch = 0 : i64, scratch_operands = 5 : i64, tpu.core_type = #tpu.core_type<tc>, window_params = [{transform_indices = @transform_0, window_bounds = array<i64: 1, 4, 256>}, {pipeline_mode = #tpu.pipeline_mode<synchronous>, transform_indices = @transform_1, window_bounds = array<i64: 16, 4>}, {pipeline_mode = #tpu.pipeline_mode<synchronous>, transform_indices = @transform_2, window_bounds = array<i64: 16, 1>}, {pipeline_mode = #tpu.pipeline_mode<synchronous>, transform_indices = @transform_3, window_bounds = array<i64: 2, 16, 16>}, {pipeline_mode = #tpu.pipeline_mode<synchronous>, transform_indices = @transform_4, window_bounds = array<i64: 2, 16, 1>}, {pipeline_mode = #tpu.pipeline_mode<synchronous>, transform_indices = @transform_5, window_bounds = array<i64: 2, 16, 1>}, {pipeline_mode = #tpu.pipeline_mode<synchronous>, transform_indices = @transform_6, window_bounds = array<i64: 2, 16, 1>}, {pipeline_mode = #tpu.pipeline_mode<synchronous>, transform_indices = @transform_7, window_bounds = array<i64: 4, 16>}, {pipeline_mode = #tpu.pipeline_mode<synchronous>, transform_indices = @transform_8, window_bounds = array<i64: 4, 1>}, {transform_indices = @transform_9, window_bounds = array<i64: 1, 4, 256>}]} {
    %c1_i32 = arith.constant 1 : i32
    %0 = arith.muli %arg1, %c1_i32 : i32
    %1 = arith.addi %0, %arg2 : i32
    %c0_i32 = arith.constant 0 : i32
    %2 = arith.cmpi eq, %arg1, %c0_i32 : i32
    %c0_i32_0 = arith.constant 0 : i32
    %3 = arith.cmpi eq, %arg2, %c0_i32_0 : i32
    %4 = arith.andi %2, %3 : i1
    %5 = arith.extui %4 : i1 to i32
    %c0_i32_1 = arith.constant 0 : i32
    %6 = arith.cmpi ne, %5, %c0_i32_1 : i32
    scf.if %6 {
      %c0_i32_8 = arith.constant 0 : i32
      %18 = arith.cmpi sgt, %arg0, %c0_i32_8 : i32
      %19 = arith.extui %18 : i1 to i32
      %c0_i32_9 = arith.constant 0 : i32
      %20 = arith.cmpi ne, %19, %c0_i32_9 : i32
      scf.if %20 {
        %c0_14 = arith.constant 0 : index
        %c0_15 = arith.constant 0 : index
        %25 = vector.load %arg14[%c0_14, %c0_15] : memref<16x1xf32, #tpu.memory_space<vmem>>, vector<16x1xf32>
        %cst_16 = arith.constant 0.001953125 : f32
        %26 = vector.broadcast %cst_16 : f32 to vector<16x1xf32>
        %27 = arith.mulf %25, %26 : vector<16x1xf32>
        %c0_17 = arith.constant 0 : index
        %c0_18 = arith.constant 0 : index
        %28 = vector.load %arg15[%c0_17, %c0_18] : memref<16x1xf32, #tpu.memory_space<vmem>>, vector<16x1xf32>
        %cst_19 = arith.constant 0.001953125 : f32
        %29 = vector.broadcast %cst_19 : f32 to vector<16x1xf32>
        %30 = arith.mulf %28, %29 : vector<16x1xf32>
        %31 = arith.mulf %27, %27 : vector<16x1xf32>
        %32 = arith.subf %30, %31 : vector<16x1xf32>
        %cst_20 = arith.constant 0.000000e+00 : f32
        %33 = vector.broadcast %cst_20 : f32 to vector<16x1xf32>
        %34 = arith.maximumf %32, %33 : vector<16x1xf32>
        %c1_i32_21 = arith.constant 1 : i32
        %35 = arith.subi %arg0, %c1_i32_21 : i32
        %36 = arith.index_cast %35 : i32 to index
        %c0_22 = arith.constant 0 : index
        %c0_23 = arith.constant 0 : index
        %37 = vector.load %arg8[%36, %c0_22, %c0_23] : memref<2x16x1xf32, #tpu.memory_space<vmem>>, vector<1x16x1xf32>
        %38 = vector.shape_cast %37 : vector<1x16x1xf32> to vector<16x1xf32>
        %cst_24 = arith.constant 9.99999974E-6 : f32
        %39 = vector.broadcast %cst_24 : f32 to vector<16x1xf32>
        %40 = arith.addf %34, %39 : vector<16x1xf32>
        %41 = math.rsqrt %40 : vector<16x1xf32>
        %42 = arith.mulf %38, %41 : vector<16x1xf32>
        %c0_25 = arith.constant 0 : index
        %c0_26 = arith.constant 0 : index
        %43 = vector.load %arg16[%c0_25, %c0_26] : memref<16x1xf32, #tpu.memory_space<vmem>>, vector<16x1xf32>
        tpu.vector_store %arg16[%c0_25, %c0_26], %42 {strides = array<i32>} : memref<16x1xf32, #tpu.memory_space<vmem>>, vector<16x1xf32>,
        %c1_i32_27 = arith.constant 1 : i32
        %44 = arith.subi %arg0, %c1_i32_27 : i32
        %45 = arith.index_cast %44 : i32 to index
        %c0_28 = arith.constant 0 : index
        %c0_29 = arith.constant 0 : index
        %46 = vector.load %arg9[%45, %c0_28, %c0_29] : memref<2x16x1xf32, #tpu.memory_space<vmem>>, vector<1x16x1xf32>
        %47 = vector.shape_cast %46 : vector<1x16x1xf32> to vector<16x1xf32>
        %48 = arith.mulf %27, %42 : vector<16x1xf32>
        %49 = arith.subf %47, %48 : vector<16x1xf32>
        %c0_30 = arith.constant 0 : index
        %c0_31 = arith.constant 0 : index
        %50 = vector.load %arg17[%c0_30, %c0_31] : memref<16x1xf32, #tpu.memory_space<vmem>>, vector<16x1xf32>
        tpu.vector_store %arg17[%c0_30, %c0_31], %49 {strides = array<i32>} : memref<16x1xf32, #tpu.memory_space<vmem>>, vector<16x1xf32>,
      } else {
      }
      %cst = arith.constant 0.000000e+00 : f32
      %21 = vector.broadcast %cst : f32 to vector<16x1xf32>
      %c0 = arith.constant 0 : index
      %c0_10 = arith.constant 0 : index
      %22 = vector.load %arg14[%c0, %c0_10] : memref<16x1xf32, #tpu.memory_space<vmem>>, vector<16x1xf32>
      tpu.vector_store %arg14[%c0, %c0_10], %21 {strides = array<i32>} : memref<16x1xf32, #tpu.memory_space<vmem>>, vector<16x1xf32>,
      %cst_11 = arith.constant 0.000000e+00 : f32
      %23 = vector.broadcast %cst_11 : f32 to vector<16x1xf32>
      %c0_12 = arith.constant 0 : index
      %c0_13 = arith.constant 0 : index
      %24 = vector.load %arg15[%c0_12, %c0_13] : memref<16x1xf32, #tpu.memory_space<vmem>>, vector<16x1xf32>
      tpu.vector_store %arg15[%c0_12, %c0_13], %23 {strides = array<i32>} : memref<16x1xf32, #tpu.memory_space<vmem>>, vector<16x1xf32>,
    } else {
    }
    %c0_i32_2 = arith.constant 0 : i32
    %7 = arith.cmpi eq, %arg0, %c0_i32_2 : i32
    %8 = arith.extui %7 : i1 to i32
    %c0_i32_3 = arith.constant 0 : i32
    %9 = arith.cmpi ne, %8, %c0_i32_3 : i32
    scf.if %9 {
      %c0 = arith.constant 0 : index
      %c0_8 = arith.constant 0 : index
      %c0_9 = arith.constant 0 : index
      %18 = vector.load %arg3[%c0, %c0_8, %c0_9] : memref<1x4x256xf32, #tpu.memory_space<vmem>>, vector<1x4x256xf32>
      %19 = vector.shape_cast %18 : vector<1x4x256xf32> to vector<4x256xf32>
      %c0_10 = arith.constant 0 : index
      %c0_11 = arith.constant 0 : index
      %20 = vector.load %arg4[%c0_10, %c0_11] : memref<16x4xf32, #tpu.memory_space<vmem>>, vector<16x4xf32>
      %cst = arith.constant dense<0.000000e+00> : vector<16x256xf32>
      %21 = tpu.matmul %20, %19, %cst {dimension_numbers = #tpu.dot_dimension_numbers<[1], [0], [0], [1], [0, 0, 1, 1], [], []>} : vector<16x4xf32>, vector<4x256xf32>, vector<16x256xf32> -> vector<16x256xf32>
      %c0_12 = arith.constant 0 : index
      %c0_13 = arith.constant 0 : index
      %22 = vector.load %arg5[%c0_12, %c0_13] : memref<16x1xf32, #tpu.memory_space<vmem>>, vector<16x1xf32>
      %23 = vector.broadcast %22 : vector<16x1xf32> to vector<16x256xf32>
      %24 = arith.addf %21, %23 : vector<16x256xf32>
      %cst_14 = arith.constant 0.000000e+00 : f32
      %25 = vector.broadcast %cst_14 : f32 to vector<16x256xf32>
      %26 = arith.maximumf %24, %25 : vector<16x256xf32>
      %c0_15 = arith.constant 0 : index
      %c0_16 = arith.constant 0 : index
      %c0_17 = arith.constant 0 : index
      %27 = vector.load %arg6[%c0_15, %c0_16, %c0_17] : memref<2x16x16xf32, #tpu.memory_space<vmem>>, vector<1x16x16xf32>
      %28 = vector.shape_cast %27 : vector<1x16x16xf32> to vector<16x16xf32>
      %cst_18 = arith.constant dense<0.000000e+00> : vector<16x256xf32>
      %29 = tpu.matmul %28, %26, %cst_18 {dimension_numbers = #tpu.dot_dimension_numbers<[1], [0], [0], [1], [0, 0, 1, 1], [], []>} : vector<16x16xf32>, vector<16x256xf32>, vector<16x256xf32> -> vector<16x256xf32>
      %c0_19 = arith.constant 0 : index
      %c0_20 = arith.constant 0 : index
      %c0_21 = arith.constant 0 : index
      %30 = vector.load %arg7[%c0_19, %c0_20, %c0_21] : memref<2x16x1xf32, #tpu.memory_space<vmem>>, vector<1x16x1xf32>
      %31 = vector.shape_cast %30 : vector<1x16x1xf32> to vector<16x1xf32>
      %32 = vector.broadcast %31 : vector<16x1xf32> to vector<16x256xf32>
      %33 = arith.addf %29, %32 : vector<16x256xf32>
      %34 = arith.index_cast %1 : i32 to index
      %c0_22 = arith.constant 0 : index
      %c0_23 = arith.constant 0 : index
      %35 = vector.load %arg13[%34, %c0_22, %c0_23] : memref<2x16x256xf32, #tpu.memory_space<vmem>>, vector<1x16x256xf32>
      %36 = vector.shape_cast %35 : vector<1x16x256xf32> to vector<16x256xf32>
      %37 = vector.shape_cast %33 : vector<16x256xf32> to vector<1x16x256xf32>
      tpu.vector_store %arg13[%34, %c0_22, %c0_23], %37 {strides = array<i32>} : memref<2x16x256xf32, #tpu.memory_space<vmem>>, vector<1x16x256xf32>,
      %c0_24 = arith.constant 0 : index
      %c0_25 = arith.constant 0 : index
      %38 = vector.load %arg14[%c0_24, %c0_25] : memref<16x1xf32, #tpu.memory_space<vmem>>, vector<16x1xf32>
      %cst_26 = arith.constant dense<0.000000e+00> : vector<16xf32>
      %39 = vector.multi_reduction <add>, %33, %cst_26 [1] : vector<16x256xf32> to vector<16xf32>
      %40 = vector.shape_cast %39 : vector<16xf32> to vector<16x1xf32>
      %41 = arith.addf %38, %40 : vector<16x1xf32>
      %c0_27 = arith.constant 0 : index
      %c0_28 = arith.constant 0 : index
      %42 = vector.load %arg14[%c0_27, %c0_28] : memref<16x1xf32, #tpu.memory_space<vmem>>, vector<16x1xf32>
      tpu.vector_store %arg14[%c0_27, %c0_28], %41 {strides = array<i32>} : memref<16x1xf32, #tpu.memory_space<vmem>>, vector<16x1xf32>,
      %c0_29 = arith.constant 0 : index
      %c0_30 = arith.constant 0 : index
      %43 = vector.load %arg15[%c0_29, %c0_30] : memref<16x1xf32, #tpu.memory_space<vmem>>, vector<16x1xf32>
      %44 = arith.mulf %33, %33 : vector<16x256xf32>
      %cst_31 = arith.constant dense<0.000000e+00> : vector<16xf32>
      %45 = vector.multi_reduction <add>, %44, %cst_31 [1] : vector<16x256xf32> to vector<16xf32>
      %46 = vector.shape_cast %45 : vector<16xf32> to vector<16x1xf32>
      %47 = arith.addf %43, %46 : vector<16x1xf32>
      %c0_32 = arith.constant 0 : index
      %c0_33 = arith.constant 0 : index
      %48 = vector.load %arg15[%c0_32, %c0_33] : memref<16x1xf32, #tpu.memory_space<vmem>>, vector<16x1xf32>
      tpu.vector_store %arg15[%c0_32, %c0_33], %47 {strides = array<i32>} : memref<16x1xf32, #tpu.memory_space<vmem>>, vector<16x1xf32>,
    } else {
    }
    %c0_i32_4 = arith.constant 0 : i32
    %10 = arith.cmpi sgt, %arg0, %c0_i32_4 : i32
    %c2_i32 = arith.constant 2 : i32
    %11 = arith.cmpi slt, %arg0, %c2_i32 : i32
    %12 = arith.andi %10, %11 : i1
    %13 = arith.extui %12 : i1 to i32
    %c0_i32_5 = arith.constant 0 : i32
    %14 = arith.cmpi ne, %13, %c0_i32_5 : i32
    scf.if %14 {
      %18 = arith.index_cast %1 : i32 to index
      %c0 = arith.constant 0 : index
      %c0_8 = arith.constant 0 : index
      %19 = vector.load %arg13[%18, %c0, %c0_8] : memref<2x16x256xf32, #tpu.memory_space<vmem>>, vector<1x16x256xf32>
      %20 = vector.shape_cast %19 : vector<1x16x256xf32> to vector<16x256xf32>
      %c0_9 = arith.constant 0 : index
      %c0_10 = arith.constant 0 : index
      %21 = vector.load %arg16[%c0_9, %c0_10] : memref<16x1xf32, #tpu.memory_space<vmem>>, vector<16x1xf32>
      %22 = vector.broadcast %21 : vector<16x1xf32> to vector<16x256xf32>
      %23 = arith.mulf %20, %22 : vector<16x256xf32>
      %c0_11 = arith.constant 0 : index
      %c0_12 = arith.constant 0 : index
      %24 = vector.load %arg17[%c0_11, %c0_12] : memref<16x1xf32, #tpu.memory_space<vmem>>, vector<16x1xf32>
      %25 = vector.broadcast %24 : vector<16x1xf32> to vector<16x256xf32>
      %26 = arith.addf %23, %25 : vector<16x256xf32>
      %cst = arith.constant 0.000000e+00 : f32
      %27 = vector.broadcast %cst : f32 to vector<16x256xf32>
      %28 = arith.maximumf %26, %27 : vector<16x256xf32>
      %29 = arith.index_cast %arg0 : i32 to index
      %c0_13 = arith.constant 0 : index
      %c0_14 = arith.constant 0 : index
      %30 = vector.load %arg6[%29, %c0_13, %c0_14] : memref<2x16x16xf32, #tpu.memory_space<vmem>>, vector<1x16x16xf32>
      %31 = vector.shape_cast %30 : vector<1x16x16xf32> to vector<16x16xf32>
      %cst_15 = arith.constant dense<0.000000e+00> : vector<16x256xf32>
      %32 = tpu.matmul %31, %28, %cst_15 {dimension_numbers = #tpu.dot_dimension_numbers<[1], [0], [0], [1], [0, 0, 1, 1], [], []>} : vector<16x16xf32>, vector<16x256xf32>, vector<16x256xf32> -> vector<16x256xf32>
      %33 = arith.index_cast %arg0 : i32 to index
      %c0_16 = arith.constant 0 : index
      %c0_17 = arith.constant 0 : index
      %34 = vector.load %arg7[%33, %c0_16, %c0_17] : memref<2x16x1xf32, #tpu.memory_space<vmem>>, vector<1x16x1xf32>
      %35 = vector.shape_cast %34 : vector<1x16x1xf32> to vector<16x1xf32>
      %36 = vector.broadcast %35 : vector<16x1xf32> to vector<16x256xf32>
      %37 = arith.addf %32, %36 : vector<16x256xf32>
      %38 = arith.index_cast %1 : i32 to index
      %c0_18 = arith.constant 0 : index
      %c0_19 = arith.constant 0 : index
      %39 = vector.load %arg13[%38, %c0_18, %c0_19] : memref<2x16x256xf32, #tpu.memory_space<vmem>>, vector<1x16x256xf32>
      %40 = vector.shape_cast %39 : vector<1x16x256xf32> to vector<16x256xf32>
      %41 = vector.shape_cast %37 : vector<16x256xf32> to vector<1x16x256xf32>
      tpu.vector_store %arg13[%38, %c0_18, %c0_19], %41 {strides = array<i32>} : memref<2x16x256xf32, #tpu.memory_space<vmem>>, vector<1x16x256xf32>,
      %c0_20 = arith.constant 0 : index
      %c0_21 = arith.constant 0 : index
      %42 = vector.load %arg14[%c0_20, %c0_21] : memref<16x1xf32, #tpu.memory_space<vmem>>, vector<16x1xf32>
      %cst_22 = arith.constant dense<0.000000e+00> : vector<16xf32>
      %43 = vector.multi_reduction <add>, %37, %cst_22 [1] : vector<16x256xf32> to vector<16xf32>
      %44 = vector.shape_cast %43 : vector<16xf32> to vector<16x1xf32>
      %45 = arith.addf %42, %44 : vector<16x1xf32>
      %c0_23 = arith.constant 0 : index
      %c0_24 = arith.constant 0 : index
      %46 = vector.load %arg14[%c0_23, %c0_24] : memref<16x1xf32, #tpu.memory_space<vmem>>, vector<16x1xf32>
      tpu.vector_store %arg14[%c0_23, %c0_24], %45 {strides = array<i32>} : memref<16x1xf32, #tpu.memory_space<vmem>>, vector<16x1xf32>,
      %c0_25 = arith.constant 0 : index
      %c0_26 = arith.constant 0 : index
      %47 = vector.load %arg15[%c0_25, %c0_26] : memref<16x1xf32, #tpu.memory_space<vmem>>, vector<16x1xf32>
      %48 = arith.mulf %37, %37 : vector<16x256xf32>
      %cst_27 = arith.constant dense<0.000000e+00> : vector<16xf32>
      %49 = vector.multi_reduction <add>, %48, %cst_27 [1] : vector<16x256xf32> to vector<16xf32>
      %50 = vector.shape_cast %49 : vector<16xf32> to vector<16x1xf32>
      %51 = arith.addf %47, %50 : vector<16x1xf32>
      %c0_28 = arith.constant 0 : index
      %c0_29 = arith.constant 0 : index
      %52 = vector.load %arg15[%c0_28, %c0_29] : memref<16x1xf32, #tpu.memory_space<vmem>>, vector<16x1xf32>
      tpu.vector_store %arg15[%c0_28, %c0_29], %51 {strides = array<i32>} : memref<16x1xf32, #tpu.memory_space<vmem>>, vector<16x1xf32>,
    } else {
    }
    %c2_i32_6 = arith.constant 2 : i32
    %15 = arith.cmpi eq, %arg0, %c2_i32_6 : i32
    %16 = arith.extui %15 : i1 to i32
    %c0_i32_7 = arith.constant 0 : i32
    %17 = arith.cmpi ne, %16, %c0_i32_7 : i32
    scf.if %17 {
      %18 = arith.index_cast %1 : i32 to index
      %c0 = arith.constant 0 : index
      %c0_8 = arith.constant 0 : index
      %19 = vector.load %arg13[%18, %c0, %c0_8] : memref<2x16x256xf32, #tpu.memory_space<vmem>>, vector<1x16x256xf32>
      %20 = vector.shape_cast %19 : vector<1x16x256xf32> to vector<16x256xf32>
      %c0_9 = arith.constant 0 : index
      %c0_10 = arith.constant 0 : index
      %21 = vector.load %arg16[%c0_9, %c0_10] : memref<16x1xf32, #tpu.memory_space<vmem>>, vector<16x1xf32>
      %22 = vector.broadcast %21 : vector<16x1xf32> to vector<16x256xf32>
      %23 = arith.mulf %20, %22 : vector<16x256xf32>
      %c0_11 = arith.constant 0 : index
      %c0_12 = arith.constant 0 : index
      %24 = vector.load %arg17[%c0_11, %c0_12] : memref<16x1xf32, #tpu.memory_space<vmem>>, vector<16x1xf32>
      %25 = vector.broadcast %24 : vector<16x1xf32> to vector<16x256xf32>
      %26 = arith.addf %23, %25 : vector<16x256xf32>
      %cst = arith.constant 0.000000e+00 : f32
      %27 = vector.broadcast %cst : f32 to vector<16x256xf32>
      %28 = arith.maximumf %26, %27 : vector<16x256xf32>
      %c0_13 = arith.constant 0 : index
      %c0_14 = arith.constant 0 : index
      %29 = vector.load %arg10[%c0_13, %c0_14] : memref<4x16xf32, #tpu.memory_space<vmem>>, vector<4x16xf32>
      %cst_15 = arith.constant dense<0.000000e+00> : vector<4x256xf32>
      %30 = tpu.matmul %29, %28, %cst_15 {dimension_numbers = #tpu.dot_dimension_numbers<[1], [0], [0], [1], [0, 0, 1, 1], [], []>} : vector<4x16xf32>, vector<16x256xf32>, vector<4x256xf32> -> vector<4x256xf32>
      %c0_16 = arith.constant 0 : index
      %c0_17 = arith.constant 0 : index
      %31 = vector.load %arg11[%c0_16, %c0_17] : memref<4x1xf32, #tpu.memory_space<vmem>>, vector<4x1xf32>
      %32 = vector.broadcast %31 : vector<4x1xf32> to vector<4x256xf32>
      %33 = arith.addf %30, %32 : vector<4x256xf32>
      %c0_18 = arith.constant 0 : index
      %c0_19 = arith.constant 0 : index
      %c0_20 = arith.constant 0 : index
      %34 = vector.load %arg12[%c0_18, %c0_19, %c0_20] : memref<1x4x256xf32, #tpu.memory_space<vmem>>, vector<1x4x256xf32>
      %35 = vector.shape_cast %34 : vector<1x4x256xf32> to vector<4x256xf32>
      %36 = vector.shape_cast %33 : vector<4x256xf32> to vector<1x4x256xf32>
      tpu.vector_store %arg12[%c0_18, %c0_19, %c0_20], %36 {strides = array<i32>} : memref<1x4x256xf32, #tpu.memory_space<vmem>>, vector<1x4x256xf32>,
    } else {
    }
    return
  }
  func.func @transform_0(%arg0: i32, %arg1: i32, %arg2: i32) -> (i32, i32, i32) {
    %c0_i32 = arith.constant 0 : i32
    %0 = arith.cmpi eq, %arg0, %c0_i32 : i32
    %c0_i32_0 = arith.constant 0 : i32
    %1 = arith.select %0, %arg1, %c0_i32_0 : i32
    %c0_i32_1 = arith.constant 0 : i32
    %2 = arith.cmpi eq, %arg0, %c0_i32_1 : i32
    %c0_i32_2 = arith.constant 0 : i32
    %3 = arith.select %2, %arg2, %c0_i32_2 : i32
    %c0_i32_3 = arith.constant 0 : i32
    %c0_i32_4 = arith.constant 0 : i32
    return %1, %c0_i32_3, %3 : i32, i32, i32
  }
  func.func @transform_1(%arg0: i32, %arg1: i32, %arg2: i32) -> (i32, i32) {
    %c0_i32 = arith.constant 0 : i32
    %c0_i32_0 = arith.constant 0 : i32
    %c0_i32_1 = arith.constant 0 : i32
    return %c0_i32, %c0_i32_0 : i32, i32
  }
  func.func @transform_2(%arg0: i32, %arg1: i32, %arg2: i32) -> (i32, i32) {
    %c0_i32 = arith.constant 0 : i32
    %c0_i32_0 = arith.constant 0 : i32
    %c0_i32_1 = arith.constant 0 : i32
    return %c0_i32, %c0_i32_0 : i32, i32
  }
  func.func @transform_3(%arg0: i32, %arg1: i32, %arg2: i32) -> (i32, i32, i32) {
    %c0_i32 = arith.constant 0 : i32
    %c0_i32_0 = arith.constant 0 : i32
    %c0_i32_1 = arith.constant 0 : i32
    %c0_i32_2 = arith.constant 0 : i32
    return %c0_i32, %c0_i32_0, %c0_i32_1 : i32, i32, i32
  }
  func.func @transform_4(%arg0: i32, %arg1: i32, %arg2: i32) -> (i32, i32, i32) {
    %c0_i32 = arith.constant 0 : i32
    %c0_i32_0 = arith.constant 0 : i32
    %c0_i32_1 = arith.constant 0 : i32
    %c0_i32_2 = arith.constant 0 : i32
    return %c0_i32, %c0_i32_0, %c0_i32_1 : i32, i32, i32
  }
  func.func @transform_5(%arg0: i32, %arg1: i32, %arg2: i32) -> (i32, i32, i32) {
    %c0_i32 = arith.constant 0 : i32
    %c0_i32_0 = arith.constant 0 : i32
    %c0_i32_1 = arith.constant 0 : i32
    %c0_i32_2 = arith.constant 0 : i32
    return %c0_i32, %c0_i32_0, %c0_i32_1 : i32, i32, i32
  }
  func.func @transform_6(%arg0: i32, %arg1: i32, %arg2: i32) -> (i32, i32, i32) {
    %c0_i32 = arith.constant 0 : i32
    %c0_i32_0 = arith.constant 0 : i32
    %c0_i32_1 = arith.constant 0 : i32
    %c0_i32_2 = arith.constant 0 : i32
    return %c0_i32, %c0_i32_0, %c0_i32_1 : i32, i32, i32
  }
  func.func @transform_7(%arg0: i32, %arg1: i32, %arg2: i32) -> (i32, i32) {
    %c0_i32 = arith.constant 0 : i32
    %c0_i32_0 = arith.constant 0 : i32
    %c0_i32_1 = arith.constant 0 : i32
    return %c0_i32, %c0_i32_0 : i32, i32
  }
  func.func @transform_8(%arg0: i32, %arg1: i32, %arg2: i32) -> (i32, i32) {
    %c0_i32 = arith.constant 0 : i32
    %c0_i32_0 = arith.constant 0 : i32
    %c0_i32_1 = arith.constant 0 : i32
    return %c0_i32, %c0_i32_0 : i32, i32
  }
  func.func @transform_9(%arg0: i32, %arg1: i32, %arg2: i32) -> (i32, i32, i32) {
    %c2_i32 = arith.constant 2 : i32
    %0 = arith.cmpi eq, %arg0, %c2_i32 : i32
    %c0_i32 = arith.constant 0 : i32
    %1 = arith.select %0, %arg1, %c0_i32 : i32
    %c2_i32_0 = arith.constant 2 : i32
    %2 = arith.cmpi eq, %arg0, %c2_i32_0 : i32
    %c0_i32_1 = arith.constant 0 : i32
    %3 = arith.select %2, %arg2, %c0_i32_1 : i32
    %c0_i32_2 = arith.constant 0 : i32
    %c0_i32_3 = arith.constant 0 : i32
    return %1, %c0_i32_2, %3 : i32, i32, i32
  }
}

</mosaic_0001>

<bundles_post_ra>
// kernel: denoising_single_orient_forward.1
= control target key start
LH: loop header
LB: loop body
LE: loop exit
PB: predicated region body
PF: predicated region fallthrough
CT: control target
= control target key end

     0   :  { %s1643_s0 = inlined_call_operand.vmem [shape: f32[2,4,256], index: 0, kind: input, shape index: {}]   ;;  %s1644_s1 = inlined_call_operand.vmem [shape: f32[16,4], index: 1, kind: input, shape index: {}]   ;;  %s1645_s2 = inlined_call_operand.vmem [shape: f32[16,1], index: 2, kind: input, shape index: {}]   ;;  %s1646_s3 = inlined_call_operand.vmem [shape: f32[2,16,16], index: 3, kind: input, shape index: {}]   ;;  %s1647_s4 = inlined_call_operand.vmem [shape: f32[2,16,1], index: 4, kind: input, shape index: {}]   ;;  %s1648_s5 = inlined_call_operand.vmem [shape: f32[2,16,1], index: 5, kind: input, shape index: {}]   ;;  %s1649_s6 = inlined_call_operand.vmem [shape: f32[2,16,1], index: 6, kind: input, shape index: {}]   ;;  %s1650_s7 = inlined_call_operand.vmem [shape: f32[4,16], index: 7, kind: input, shape index: {}]   ;;  %s1651_s8 = inlined_call_operand.vmem [shape: f32[4,1], index: 8, kind: input, shape index: {}]   ;;  %s1652_s9 = inlined_call_operand.hbm [shape: f32[2,4,256], index: 9, kind: output, shape index: {}]  }
   0x1   :  { %1655 = sst [smem:[#allocation11_spill]] %s1643_s0 }
   0x2   :  { %1656 = sst [smem:[#allocation12_spill]] %s1644_s1 }
   0x3   :  { %14 = vsyncpa [#allocation8], 0 }
   0x4   :  { %16 = vsyncpa [#allocation8 + $0x1], 0  ;;  %s1434_s30 = smov 0   ;;  %s1436_s10 = smov 0  }
   0x5   :  { %s1438_s11 = smov 0   ;;  %s1440_s12 = smov 0  }
   0x6   :  { %s1442_s13 = smov 0   ;;  %s1444_s14 = smov 0  }
   0x7   :  { %s1446_s15 = smov 0   ;;  %s1448_s16 = smov 0  }
   0x8 LB: > { %s1136_s17 = sadd.s32 4294967295, %s1374_s16   ;;  %s37_s18 = sadd.s32 1, %s1366_s14  ;;  %s1374_s16 = sphi %s1448_s16, %s22_s16   ;;  %s1370_s15 = sphi %s1446_s15, %s1672_s15   ;;  %s1366_s14 = sphi %s1444_s14, %s1671_s14   ;;  %s1362_s13 = sphi %s1442_s13, %s1670_s13   ;;  %s1358_s12 = sphi %s1440_s12, %s1669_s12   ;;  %s1354_s11 = sphi %s1438_s11, %s1668_s11   ;;  %s1350_s10 = sphi %s1436_s10, %s1667_s10   ;;  %s1346_s30 = sphi %s1434_s30, %s1666_s30  }
   0x9   : > { %s41_s19 = sadd.s32 1, %s1370_s15  ;;  %p39_p0 = scmp.ge.s32.totalorder %s37_s18, 2 }
   0xa   : > { %p247_p1 = scmp.eq.s32.totalorder %s1370_s15, 2  ;;  %s1137_s20 = sadd.s32 4294967294, %s1374_s16  }
   0xb   : > { %p268_p2 = scmp.ne.s32.totalorder %s1354_s11, %s1350_s10  ;;  %s1674_s18 = smov (%p39_p0, %s37_s18), 0 }
   0xc   : > { %s1676_s19 = smov (!%p39_p0, %s41_s19), %s1370_s15  ;;  %p269_p4 = scmp.eq.s32.totalorder %s1136_s17, 5 }
   0xd   : > { %s248_s21 = scalar_select %p247_p1, %s1366_s14, 0 }
   0xe   : > { %p43_p3 = scmp.ge.s32.totalorder %s1676_s19, 3  ;;  %p274_p5 = scmp.ne.s32.totalorder %s1350_s10, %s1346_s30 }
   0xf   : > { %p275_p6 = scmp.eq.s32.totalorder %s1137_s20, 5  ;;  %p1489_p7 = por %p269_p4, %p268_p2 }
  0x10   : > { %s1678_s19 = smov (%p43_p3, %s1676_s19), 0  ;;  %p1140_p10 = scmp.ge.s32.totalorder %s1374_s16, 1 }
  0x11   : > { %1657 = sst [smem:[#allocation10_spill]] %s1678_s19  ;;  %p1493_p8 = por %p275_p6, %p274_p5 }
  0x12   : > { %p250_p9 = scmp.eq.s32.totalorder %s1678_s19, 2  ;;  %p336_p11 = scmp.lt.s32.totalorder %s1374_s16, 7 }
  0x13   : > { %s258_s26 = sadd.s32 1, %s1354_s11 }
  0x14   : > { %s251_s24 = scalar_select %p250_p9, %s1674_s18, 0 }
  0x15   : > { %p337_p12 = pnand %p1140_p10, %p336_p11 }
  0x16   : > { %s253_s25 = ssub.s32 %s248_s21, %s251_s24  ;;  %s1653_s28 = sand.u32 (!%p337_p12), 1, %s1350_s10  }
  0x17   : > { %p256_p13 = scmp.eq.s32.totalorder %s253_s25, 0  ;;  %340 = sbr.rel (%p337_p12) target bundleno = 1587 (0x633), region = 56 }
  0x18   : > { %p379_p0 = scmp.eq.s32.totalorder (!%p337_p12), %s1362_s13, 0  ;;  %s1509_s29 = sshll.u32 (!%p337_p12), %s1653_s28, 3 }
  0x19   : > { %s1503_s27 = scalar_select %p256_p13, %s1354_s11, %s258_s26  }
  0x1a   : > { %p400_p1 = scmp.eq.s32.totalorder (!%p337_p12), %s1358_s12, 0  ;;  %s1660_s0 = sld [smem:[#allocation11_spill]] (!%p337_p12) }
  0x1e   : > { %s380_s17 = scalar_select %p379_p0, %s1358_s12, 0 }
  0x1f   : > { %405 = sbr.rel (!%p400_p1) target bundleno = 71 (0x47), region = 60  ;;  %p1145_p3 = scmp.le.s32.totalorder (%p400_p1), %s1362_s13, 0 }
  0x20   : > { %p383_p2 = scmp.lt.s32.totalorder %s380_s17, 1 }
  0x22   : > { %s1680_s17 = smov (!%p383_p2, %s380_s17), 1 }
  0x23   : > { %s1171_s20 = sshll.u32 %s1680_s17, 3 }
  0x24   : > { %s1516_s25 = scalar_lea.vmem %s1660_s0, %s1171_s20 }
  0x26   : > { %409 = sbr.rel (%p1145_p3) target bundleno = 68 (0x44), region = 64  ;;  %v410_v0 = vld [vmem:[#allocation3] sm:$0xff] (!%p1145_p3)  ;;  %v414_v1 = vld [vmem:[#allocation4] sm:$0xff] (!%p1145_p3)  ;;  %v411_v2 = vld [vmem:[#allocation3 + $0x8] sm:$0xff] (!%p1145_p3)  ;;  %s1146_s17 = sadd.s32 (!%p1145_p3), 4294967295, %s1362_s13  ;;  %vm435_vm0 = vcmask (!%p1145_p3), 7168  }
  0x27   : > { %v412_v3 = vmul.f32 (!%p1145_p3), 0.001953125, %v410_v0  ;;  %v416_v4 = vmul.f32 (!%p1145_p3), 0.001953125, %v414_v1  ;;  %v413_v5 = vmul.f32 (!%p1145_p3), 0.001953125, %v411_v2  ;;  %v415_v6 = vld [vmem:[#allocation4 + $0x8] sm:$0xff] (!%p1145_p3)  ;;  %s1147_s20 = sshll.u32 (!%p1145_p3), %s1146_s17, 4 }
  0x28   : > { %v417_v7 = vmul.f32 (!%p1145_p3), 0.001953125, %v415_v6  ;;  %s426_s28 = scalar_lea.vmem (!%p1145_p3), %s1648_s5, %s1147_s20  ;;  %s438_s19 = scalar_lea.vmem (!%p1145_p3), %s1649_s6, %s1147_s20 }
  0x29   : > { %v418_v8 = vmul.f32 (!%p1145_p3), %v412_v3, %v412_v3  ;;  %v419_v9 = vmul.f32 (!%p1145_p3), %v413_v5, %v413_v5  ;;  %v427_v16 = vld [vmem:[%s426_s28] sm:$0xff] (!%p1145_p3)  ;;  %v428_v17 = vld [vmem:[%s426_s28 + $0x8] sm:$0xff] (!%p1145_p3) }
  0x2a   : > { %v439_v22 = vld [vmem:[%s438_s19] sm:$0xff] (!%p1145_p3)  ;;  %v440_v24 = vld [vmem:[%s438_s19 + $0x8] sm:$0xff] (!%p1145_p3) }
  0x2b   : > { %v420_v10 = vsub.f32 (!%p1145_p3), %v416_v4, %v418_v8  ;;  %v421_v11 = vsub.f32 (!%p1145_p3), %v417_v7, %v419_v9 }
  0x2d   : > { %v422_v12 = vmax.f32 %v420_v10, 0.0  ;;  %v423_v13 = vmax.f32 %v421_v11, 0.0 }
  0x2f   : > { %v429_v14 = vadd.f32 1e-05, %v422_v12  ;;  %v430_v15 = vadd.f32 1e-05, %v423_v13 }
  0x31   : > { %1269 = vrsqrt.f32 %v429_v14 }
  0x32   : > { %1271 = vrsqrt.f32 %v430_v15 }
  0x3b   : > { %v1270_v18 = vpop.eup %1269 }
  0x3c   : > { %v1272_v19 = vpop.eup %1271  ;;  %v433_v20 = vmul.f32 %v1270_v18, %v427_v16 }
  0x3d   : > { %v434_v21 = vmul.f32 %v1272_v19, %v428_v17 }
  0x3e   : > { %436 = vst.msk [vmem:[#allocation5] sm:$0xff] %vm435_vm0, %v433_v20  ;;  %v441_v23 = vmul.f32 %v433_v20, %v412_v3 }
  0x3f   : > { %437 = vst.msk [vmem:[#allocation5 + $0x8] sm:$0xff] %vm435_vm0, %v434_v21  ;;  %v442_v25 = vmul.f32 %v434_v21, %v413_v5 }
  0x40   : > { %v443_v26 = vsub.f32 %v439_v22, %v441_v23 }
  0x41   : > { %v444_v27 = vsub.f32 %v440_v24, %v442_v25 }
  0x42   : > { %445 = vst.msk [vmem:[#allocation6] sm:$0xff] %vm435_vm0, %v443_v26 }
  0x43   : > { %446 = vst.msk [vmem:[#allocation6 + $0x8] sm:$0xff] %vm435_vm0, %v444_v27 }
  0x44 PF: > { %vm447_vm1 = vcmask 7168   ;;  %v1376_v28 = vmov 0.0  }
  0x45   : > { %448 = vst.msk [vmem:[#allocation3] sm:$0xff] %vm447_vm1, %v1376_v28  ;;  %449 = vst.msk [vmem:[#allocation3 + $0x8] sm:$0xff] %vm447_vm1, %v1376_v28 }
  0x46   : > { %450 = vst.msk [vmem:[#allocation4] sm:$0xff] %vm447_vm1, %v1376_v28  ;;  %451 = vst.msk [vmem:[#allocation4 + $0x8] sm:$0xff] %vm447_vm1, %v1376_v28 }
  0x47 PF: > { %p1148_p4 = scmp.ne.s32.totalorder %s1362_s13, 0 }
  0x48   : > { %v456_v29 = vld [vmem:[%s1516_s25] sm:$0xff] (!%p1148_p4)  ;;  %vm480_vm2 = vcmask (!%p1148_p4), 1043456   ;;  %v1377_v31 = vmov (!%p1148_p4), 0.0   ;;  %s1661_s1 = sld [smem:[#allocation12_spill]] (!%p1148_p4)  ;;  %vm473_vm3 = vcmask (!%p1148_p4), 31744   ;;  %v1378_v34 = vmov (!%p1148_p4), 0  }
  0x49   : > { %455 = sbr.rel (%p1148_p4) target bundleno = 676 (0x2a4), region = 68  ;;  %v472_v30 = vcombine.high (!%p1148_p4), %v456_v29, %v456_v29  ;;  %549 = vmatprep.mubr.f32.mxu0 (!%p1148_p4), %v1377_v31  ;;  %v459_v32 = vld [vmem:[%s1645_s2] sm:$0xff] (!%p1148_p4)  ;;  %651 = vmatprep.mubr.f32.mxu1 (!%p1148_p4), %v1377_v31  ;;  %v460_v35 = vld [vmem:[%s1645_s2 + $0x8] sm:$0xff] (!%p1148_p4)  ;;  %vm580_vm4 = vcmask (!%p1148_p4), 130048   ;;  %s1173_s21 = sshll.u32 (!%p1148_p4), %s1358_s12, 5  ;;  %vm681_vm5 = vcmask (!%p1148_p4), 7168  }
  0x4a   : > { %1273 = vset.pattern.permute.xlu0 (!%p1148_p4), %v1378_v34  ;;  %1274 = vset.pattern.permute.xlu1 (!%p1148_p4), %v1378_v34  ;;  %v568_v37 = vld [vmem:[%s1647_s4] sm:$0xff] (!%p1148_p4)  ;;  %v569_v38 = vld [vmem:[%s1647_s4 + $0x8] sm:$0xff] (!%p1148_p4)  ;;  %s666_s24 = scalar_lea.vmem (!%p1148_p4), [#allocation2], %s1173_s21 }
  0x4b   : > { %1149 = vmatprep.subr.msk.mxu0 (!%p1148_p4), %vm480_vm2, %v472_v30  ;;  %463 = vperm.xlu0 (!%p1148_p4), %1273, %v459_v32   ;;  %v566_v55 = vld [vmem:[%s1646_s3] sm:$0xff] (!%p1148_p4)  ;;  %v567_v56 = vld [vmem:[%s1646_s3 + $0x8] sm:$0xff] (!%p1148_p4) }
  0x4c   : > { %1150 = vmatpush1.msk.msra.mxu0 (!%p1148_p4), %vm480_vm2, %v456_v29  ;;  %572 = vperm.xlu1 (!%p1148_p4), %1274, %v568_v37   ;;  %v671_v11 = vld [vmem:[#allocation3] sm:$0xff] (!%p1148_p4)  ;;  %v672_v14 = vld [vmem:[#allocation3 + $0x8] sm:$0xff] (!%p1148_p4) }
  0x4d   : > { %v684_v15 = vld [vmem:[#allocation4] sm:$0xff] (!%p1148_p4)  ;;  %v685_v20 = vld [vmem:[#allocation4 + $0x8] sm:$0xff] (!%p1148_p4) }
  0x4e   : > { %v457_v33 = vld [vmem:[%s1661_s1] sm:$0xff] (!%p1148_p4)  ;;  %v458_v36 = vld [vmem:[%s1661_s1 + $0x8] sm:$0xff] (!%p1148_p4) }
  0x4f   : > { %1151 = vmatmul.mubr.msk.f32.vlgmr.msra.gmra.mrb[0].mxu0 (!%p1148_p4), %vm473_vm3, %v457_v33  ;;  %468 = vperm.xlu0 (!%p1148_p4), %1273, %v460_v35  }
  0x50   : > { %555 = vmatprep.mubr.f32.mxu0 %v1377_v31  ;;  %577 = vperm.xlu1 %1274, %v569_v38  }
  0x53   : > { %1152 = vmatmul.mubr.msk.f32.gmra.mrb[2].mxu0 %vm473_vm3, %v458_v36 }
  0xca   : > { %v464_v39 = vpop.permute.xlu0 %463 }
  0xcb   : > { %v573_v57 = vpop.permute.xlu1 %572 }
  0xce   : > { %v469_v43 = vpop.permute.xlu0 %468 }
  0xcf   : > { %v578_v63 = vpop.permute.xlu1 %577 }
 0x122   : > { %v551_v40 = vpop.f32.mrb[0].mxu0 }
 0x123   : > { %v553_v41 = vpop.f32.mrb[1].mxu0  ;;  %v552_v42 = vadd.f32 %v551_v40, %v464_v39 }
 0x124   : > { %v554_v44 = vadd.f32 %v553_v41, %v464_v39 }
 0x125   : > { %v562_v49 = vmax.f32 %v552_v42, 0.0 }
 0x126   : > { %v557_v45 = vpop.f32.mrb[2].mxu0  ;;  %v563_v51 = vmax.f32 %v554_v44, 0.0 }
 0x127   : > { %v558_v46 = vadd.f32 %v557_v45, %v469_v43  ;;  %v559_v47 = vpop.f32.mrb[3].mxu0 }
 0x128   : > { %v560_v48 = vadd.f32 %v559_v47, %v469_v43 }
 0x129   : > { %v564_v50 = vmax.f32 %v558_v46, 0.0 }
 0x12a   : > { %v565_v52 = vmax.f32 %v560_v48, 0.0 }
 0x12b   : > { %v1179_v53 = vpack.c.bf16 %v564_v50, %v562_v49 }
 0x12c   : > { %v1177_v54 = vpack.c.bf16 %v565_v52, %v563_v51 }
 0x12e   : > { %1178 = vmatprep.subr.bf16.mxu1 %v1177_v54 }
 0x12f   : > { %1180 = vmatpush1.bf16.msra.mxu1 %v1179_v53 }
 0x132   : > { %1153 = vmatmul.mubr.msk.f32.vlgmr.msra.gmra.mrb[0].mxu1 %vm580_vm4, %v566_v55 }
 0x133   : > { %657 = vmatprep.mubr.f32.mxu1 %v1377_v31 }
 0x136   : > { %1154 = vmatmul.mubr.msk.f32.gmra.mrb[2].mxu1 %vm580_vm4, %v567_v56 }
 0x205   : > { %v653_v58 = vpop.f32.mrb[0].mxu1 }
 0x206   : > { %v654_v59 = vadd.f32 %v653_v58, %v573_v57  ;;  %v655_v60 = vpop.f32.mrb[1].mxu1 }
 0x207   : > { %v656_v61 = vadd.f32 %v655_v60, %v573_v57 }
 0x208   : > { %667 = vst [vmem:[%s666_s24] sm:$0xff] %v654_v59  ;;  %v686_v62 = vmul.f32 %v654_v59, %v654_v59 }
 0x209   : > { %668 = vst [vmem:[%s666_s24 + $0x8] sm:$0xff] %v656_v61  ;;  %v659_v0 = vpop.f32.mrb[2].mxu1  ;;  %v673_v1 = vadd.f32 %v656_v61, %v654_v59  ;;  %v687_v2 = vmul.f32 %v656_v61, %v656_v61 }
 0x20a   : > { %v660_v3 = vadd.f32 %v659_v0, %v578_v63  ;;  %v661_v4 = vpop.f32.mrb[3].mxu1 }
 0x20b   : > { %v662_v5 = vadd.f32 %v661_v4, %v578_v63  ;;  %674 = vadd.xlane.f32.xlu0 %v673_v1  ;;  %v690_v6 = vadd.f32 %v687_v2, %v686_v62 }
 0x20c   : > { %669 = vst [vmem:[%s666_s24 + $0x10] sm:$0xff] %v660_v3  ;;  %v688_v7 = vmul.f32 %v660_v3, %v660_v3 }
 0x20d   : > { %670 = vst [vmem:[%s666_s24 + $0x18] sm:$0xff] %v662_v5  ;;  %v676_v8 = vadd.f32 %v662_v5, %v660_v3  ;;  %v689_v9 = vmul.f32 %v662_v5, %v662_v5 }
 0x20f   : > { %677 = vadd.xlane.f32.xlu1 %v676_v8  ;;  %691 = vadd.xlane.f32.xlu0 %v690_v6  ;;  %v693_v10 = vadd.f32 %v689_v9, %v688_v7 }
 0x213   : > { %694 = vadd.xlane.f32.xlu0 %v693_v10 }
 0x298   : > { %v675_v12 = vpop.xlane.xlu0 %674 }
 0x299   : > { %v679_v13 = vadd.f32 %v675_v12, %v671_v11 }
 0x29b   : > { %682 = vst.msk [vmem:[#allocation3] sm:$0xff] %vm681_vm5, %v679_v13 }
 0x29c   : > { %v678_v16 = vpop.xlane.xlu1 %677  ;;  %v692_v17 = vpop.xlane.xlu0 %691 }
 0x29d   : > { %v680_v18 = vadd.f32 %v678_v16, %v672_v14  ;;  %v696_v19 = vadd.f32 %v692_v17, %v684_v15 }
 0x29f   : > { %683 = vst.msk [vmem:[#allocation3 + $0x8] sm:$0xff] %vm681_vm5, %v680_v18  ;;  %698 = vst.msk [vmem:[#allocation4] sm:$0xff] %vm681_vm5, %v696_v19 }
 0x2a0   : > { %v695_v21 = vpop.xlane.xlu0 %694 }
 0x2a1   : > { %v697_v22 = vadd.f32 %v695_v21, %v685_v20 }
 0x2a3   : > { %699 = vst.msk [vmem:[#allocation4 + $0x8] sm:$0xff] %vm681_vm5, %v697_v22 }
 0x2a4 PF: > { %p700_p5 = scmp.gt.s32.totalorder %s1362_s13, 0  ;;  %p701_p6 = scmp.lt.s32.totalorder %s1362_s13, 2 }
 0x2a6   : > { %p702_p9 = pnand %p701_p6, %p700_p5 }
 0x2a7   : > { %v729_v23 = vld [vmem:[#allocation6] sm:$0xff] (!%p702_p9)  ;;  %v713_v24 = vld [vmem:[#allocation5] sm:$0xff] (!%p702_p9)  ;;  %v1379_v25 = vmov (!%p702_p9), 0   ;;  %s1159_s0 = sshll.u32 (!%p702_p9), %s1362_s13, 4  ;;  %v730_v26 = vld [vmem:[#allocation6 + $0x8] sm:$0xff] (!%p702_p9)  ;;  %v1380_v30 = vmov (!%p702_p9), 0.0  }
 0x2a8   : > { %705 = sbr.rel (%p702_p9) target bundleno = 1195 (0x4ab), region = 72  ;;  %1277 = vset.pattern.permute.xlu1 (!%p702_p9), %v1379_v25  ;;  %1276 = vset.pattern.permute.xlu0 (!%p702_p9), %v1379_v25  ;;  %v714_v27 = vld [vmem:[#allocation5 + $0x8] sm:$0xff] (!%p702_p9)  ;;  %s753_s26 = scalar_lea.vmem (!%p702_p9), %s1647_s4, %s1159_s0  ;;  %vm766_vm6 = vcmask (!%p702_p9), 130048   ;;  %v854_v10 = vld [vmem:[#allocation3] sm:$0xff] (!%p702_p9)  ;;  %vm864_vm7 = vcmask (!%p702_p9), 7168   ;;  %v867_v15 = vld [vmem:[#allocation4] sm:$0xff] (!%p702_p9) }
 0x2a9   : > { %733 = vperm.xlu1 (!%p702_p9), %1277, %v729_v23   ;;  %717 = vperm.xlu0 (!%p702_p9), %1276, %v713_v24   ;;  %v755_v28 = vld [vmem:[%s753_s26 + $0x8] sm:$0xff] (!%p702_p9)  ;;  %v754_v29 = vld [vmem:[%s753_s26] sm:$0xff] (!%p702_p9)  ;;  %s1174_s25 = sshll.u32 (!%p702_p9), %s1358_s12, 5  ;;  %s750_s24 = scalar_lea.vmem (!%p702_p9), %s1646_s3, %s1159_s0 }
 0x2aa   : > { %837 = vmatprep.mubr.f32.mxu0 (!%p702_p9), %v1380_v30  ;;  %843 = vmatprep.mubr.f32.mxu1 (!%p702_p9), %v1380_v30  ;;  %s1563_s17 = scalar_lea.vmem (!%p702_p9), [#allocation2], %s1174_s25  ;;  %v751_v53 = vld [vmem:[%s750_s24] sm:$0xff] (!%p702_p9)  ;;  %v752_v54 = vld [vmem:[%s750_s24 + $0x8] sm:$0xff] (!%p702_p9)  ;;  %v868_v18 = vld [vmem:[#allocation4 + $0x8] sm:$0xff] (!%p702_p9) }
 0x2ab   : > { %v709_v31 = vld [vmem:[%s1563_s17] sm:$0xff] (!%p702_p9)  ;;  %v710_v32 = vld [vmem:[%s1563_s17 + $0x8] sm:$0xff] (!%p702_p9)  ;;  %v711_v37 = vld [vmem:[%s1563_s17 + $0x10] sm:$0xff] (!%p702_p9) }
 0x2ac   : > { %v712_v38 = vld [vmem:[%s1563_s17 + $0x18] sm:$0xff] (!%p702_p9)  ;;  %v855_v9 = vld [vmem:[#allocation3 + $0x8] sm:$0xff] (!%p702_p9) }
 0x2ad   : > { %738 = vperm.xlu1 (!%p702_p9), %1277, %v730_v26   ;;  %722 = vperm.xlu0 (!%p702_p9), %1276, %v714_v27  }
 0x2b1   : > { %763 = vperm.xlu1 %1277, %v755_v28   ;;  %758 = vperm.xlu0 %1276, %v754_v29  }
 0x328   : > { %v734_v33 = vpop.permute.xlu1 %733  ;;  %v718_v34 = vpop.permute.xlu0 %717 }
 0x329   : > { %v725_v35 = vmul.f32 %v718_v34, %v709_v31  ;;  %v726_v36 = vmul.f32 %v718_v34, %v710_v32 }
 0x32b   : > { %v741_v40 = vadd.f32 %v734_v33, %v725_v35  ;;  %v742_v41 = vadd.f32 %v734_v33, %v726_v36 }
 0x32c   : > { %v723_v39 = vpop.permute.xlu0 %722  ;;  %v739_v44 = vpop.permute.xlu1 %738 }
 0x32d   : > { %v727_v42 = vmul.f32 %v723_v39, %v711_v37  ;;  %v728_v43 = vmul.f32 %v723_v39, %v712_v38  ;;  %v746_v47 = vmax.f32 %v742_v41, 0.0  ;;  %v745_v49 = vmax.f32 %v741_v40, 0.0 }
 0x32f   : > { %v743_v45 = vadd.f32 %v739_v44, %v727_v42  ;;  %v744_v46 = vadd.f32 %v739_v44, %v728_v43 }
 0x330   : > { %v764_v55 = vpop.permute.xlu1 %763  ;;  %v759_v56 = vpop.permute.xlu0 %758 }
 0x331   : > { %v748_v48 = vmax.f32 %v744_v46, 0.0  ;;  %v747_v50 = vmax.f32 %v743_v45, 0.0 }
 0x333   : > { %v1181_v51 = vpack.c.bf16 %v748_v48, %v746_v47  ;;  %v1183_v52 = vpack.c.bf16 %v747_v50, %v745_v49 }
 0x335   : > { %1182 = vmatprep.subr.bf16.mxu0 %v1181_v51  ;;  %1189 = vmatprep.subr.bf16.mxu1 %v1181_v51 }
 0x336   : > { %1184 = vmatpush1.bf16.msra.mxu0 %v1183_v52  ;;  %1190 = vmatpush1.bf16.msra.mxu1 %v1183_v52 }
 0x339   : > { %1160 = vmatmul.mubr.msk.f32.vlgmr.msra.gmra.mrb[0].mxu0 %vm766_vm6, %v751_v53  ;;  %1161 = vmatmul.mubr.msk.f32.vlgmr.msra.gmra.mrb[0].mxu1 %vm766_vm6, %v752_v54 }
 0x40c   : > { %v839_v57 = vpop.f32.mrb[0].mxu0  ;;  %v845_v58 = vpop.f32.mrb[0].mxu1 }
 0x40d   : > { %v840_v59 = vadd.f32 %v839_v57, %v759_v56  ;;  %v846_v60 = vadd.f32 %v845_v58, %v764_v55  ;;  %v841_v61 = vpop.f32.mrb[1].mxu0  ;;  %v847_v62 = vpop.f32.mrb[1].mxu1 }
 0x40e   : > { %v842_v63 = vadd.f32 %v841_v61, %v759_v56  ;;  %v848_v0 = vadd.f32 %v847_v62, %v764_v55 }
 0x40f   : > { %850 = vst [vmem:[%s1563_s17] sm:$0xff] %v840_v59  ;;  %852 = vst [vmem:[%s1563_s17 + $0x10] sm:$0xff] %v846_v60  ;;  %v869_v1 = vmul.f32 %v840_v59, %v840_v59  ;;  %v871_v2 = vmul.f32 %v846_v60, %v846_v60 }
 0x410   : > { %851 = vst [vmem:[%s1563_s17 + $0x8] sm:$0xff] %v842_v63  ;;  %853 = vst [vmem:[%s1563_s17 + $0x18] sm:$0xff] %v848_v0  ;;  %v859_v3 = vadd.f32 %v848_v0, %v846_v60  ;;  %v856_v4 = vadd.f32 %v842_v63, %v840_v59  ;;  %v870_v5 = vmul.f32 %v842_v63, %v842_v63 }
 0x411   : > { %v872_v6 = vmul.f32 %v848_v0, %v848_v0 }
 0x412   : > { %860 = vadd.xlane.f32.xlu1 %v859_v3  ;;  %857 = vadd.xlane.f32.xlu0 %v856_v4  ;;  %v873_v7 = vadd.f32 %v870_v5, %v869_v1 }
 0x413   : > { %v876_v8 = vadd.f32 %v872_v6, %v871_v2 }
 0x416   : > { %874 = vadd.xlane.f32.xlu0 %v873_v7 }
 0x41a   : > { %877 = vadd.xlane.f32.xlu0 %v876_v8 }
 0x49f   : > { %v861_v11 = vpop.xlane.xlu1 %860  ;;  %v858_v12 = vpop.xlane.xlu0 %857 }
 0x4a0   : > { %v863_v13 = vadd.f32 %v861_v11, %v855_v9  ;;  %v862_v14 = vadd.f32 %v858_v12, %v854_v10 }
 0x4a2   : > { %866 = vst.msk [vmem:[#allocation3 + $0x8] sm:$0xff] %vm864_vm7, %v863_v13  ;;  %865 = vst.msk [vmem:[#allocation3] sm:$0xff] %vm864_vm7, %v862_v14 }
 0x4a3   : > { %v875_v16 = vpop.xlane.xlu0 %874 }
 0x4a4   : > { %v879_v17 = vadd.f32 %v875_v16, %v867_v15 }
 0x4a6   : > { %881 = vst.msk [vmem:[#allocation4] sm:$0xff] %vm864_vm7, %v879_v17 }
 0x4a7   : > { %v878_v19 = vpop.xlane.xlu0 %877 }
 0x4a8   : > { %v880_v20 = vadd.f32 %v878_v19, %v868_v18 }
 0x4aa   : > { %882 = vst.msk [vmem:[#allocation4 + $0x8] sm:$0xff] %vm864_vm7, %v880_v20 }
 0x4ab PF: > { %p1162_p10 = scmp.ne.s32.totalorder %s1362_s13, 2 }
 0x4ac   : > { %v910_v21 = vld [vmem:[#allocation6] sm:$0xff] (!%p1162_p10)  ;;  %v894_v22 = vld [vmem:[#allocation5] sm:$0xff] (!%p1162_p10)  ;;  %v1381_v23 = vmov (!%p1162_p10), 0   ;;  %v911_v24 = vld [vmem:[#allocation6 + $0x8] sm:$0xff] (!%p1162_p10)  ;;  %v1382_v27 = vmov (!%p1162_p10), 0.0   ;;  %s1175_s28 = sshll.u32 (!%p1162_p10), %s1358_s12, 5 }
 0x4ad   : > { %886 = sbr.rel (%p1162_p10) target bundleno = 1560 (0x618), region = 76  ;;  %1279 = vset.pattern.permute.xlu1 (!%p1162_p10), %v1381_v23  ;;  %1278 = vset.pattern.permute.xlu0 (!%p1162_p10), %v1381_v23  ;;  %v895_v25 = vld [vmem:[#allocation5 + $0x8] sm:$0xff] (!%p1162_p10)  ;;  %v931_v26 = vld [vmem:[%s1651_s8] sm:$0xf] (!%p1162_p10)  ;;  %s889_s26 = scalar_lea.vmem (!%p1162_p10), [#allocation2], %s1175_s28  ;;  %vm937_vm8 = vcmask (!%p1162_p10), 130048  }
 0x4ae   : > { %914 = vperm.xlu1 (!%p1162_p10), %1279, %v910_v21   ;;  %898 = vperm.xlu0 (!%p1162_p10), %1278, %v894_v22   ;;  %v890_v28 = vld [vmem:[%s889_s26] sm:$0xff] (!%p1162_p10)  ;;  %v891_v29 = vld [vmem:[%s889_s26 + $0x8] sm:$0xff] (!%p1162_p10)  ;;  %v892_v34 = vld [vmem:[%s889_s26 + $0x10] sm:$0xff] (!%p1162_p10)  ;;  %s1662_s20 = scalar_lea.vmem (!%p1162_p10), [#allocation7], %s1509_s29 }
 0x4af   : > { %1005 = vmatprep.mubr.f32.mxu0 (!%p1162_p10), %v1382_v27  ;;  %v893_v35 = vld [vmem:[%s889_s26 + $0x18] sm:$0xff] (!%p1162_p10)  ;;  %v930_v50 = vld [vmem:[%s1650_s7] sm:$0xf] (!%p1162_p10) }
 0x4b2   : > { %919 = vperm.xlu1 (!%p1162_p10), %1279, %v911_v24   ;;  %903 = vperm.xlu0 (!%p1162_p10), %1278, %v895_v25  }
 0x4b6   : > { %934 = vperm.xlu0 %1278, %v931_v26  }
 0x52d   : > { %v915_v30 = vpop.permute.xlu1 %914  ;;  %v899_v31 = vpop.permute.xlu0 %898 }
 0x52e   : > { %v906_v32 = vmul.f32 %v899_v31, %v890_v28  ;;  %v907_v33 = vmul.f32 %v899_v31, %v891_v29 }
 0x530   : > { %v922_v37 = vadd.f32 %v915_v30, %v906_v32  ;;  %v923_v40 = vadd.f32 %v915_v30, %v907_v33 }
 0x531   : > { %v904_v36 = vpop.permute.xlu0 %903  ;;  %v920_v41 = vpop.permute.xlu1 %919 }
 0x532   : > { %v908_v38 = vmul.f32 %v904_v36, %v892_v34  ;;  %v909_v39 = vmul.f32 %v904_v36, %v893_v35  ;;  %v927_v44 = vmax.f32 %v923_v40, 0.0  ;;  %v926_v46 = vmax.f32 %v922_v37, 0.0 }
 0x534   : > { %v924_v42 = vadd.f32 %v920_v41, %v908_v38  ;;  %v925_v43 = vadd.f32 %v920_v41, %v909_v39 }
 0x535   : > { %v935_v51 = vpop.permute.xlu0 %934 }
 0x536   : > { %v929_v45 = vmax.f32 %v925_v43, 0.0  ;;  %v928_v47 = vmax.f32 %v924_v42, 0.0 }
 0x538   : > { %v1185_v48 = vpack.c.bf16 %v929_v45, %v927_v44  ;;  %v1187_v49 = vpack.c.bf16 %v928_v47, %v926_v46 }
 0x53a   : > { %1186 = vmatprep.subr.bf16.mxu0 %v1185_v48 }
 0x53b   : > { %1188 = vmatpush1.bf16.msra.mxu0 %v1187_v49 }
 0x53e   : > { %1165 = vmatmul.mubr.msk.f32.vlgmr.msra.gmra.mrb[0].mxu0 %vm937_vm8, %v930_v50 }
 0x611   : > { %v1007_v52 = vpop.f32.mrb[0].mxu0 }
 0x612   : > { %v1008_v53 = vadd.f32 %v1007_v52, %v935_v51  ;;  %v1009_v54 = vpop.f32.mrb[1].mxu0 }
 0x613   : > { %v1010_v55 = vadd.f32 %v1009_v54, %v935_v51 }
 0x615   : > { %v1014_v56 = vcombine.low %v1008_v53, %v1010_v55 }
 0x617   : > { %1016 = vst [vmem:[%s1662_s20] sm:$0xff] %v1014_v56 }
 0x618 PF: > { %p1025_p11 = scmp.eq.s32.totalorder %s1362_s13, 2  ;;  %s1663_s21 = scalar_lea.vmem [#allocation7], %s1509_s29 }
 0x619   : > { %s1037_s24 = sshll.u32 %s1663_s21, 4  ;;  %s1664_s25 = sand.u32 1, %s1350_s10   ;;  %s1592_s24 = int_to_ptr.vmem [resolvable:$true] %s1037_s24 }
 0x61a   : > { %s1682_s12 = smov (!%p1025_p11, %s1358_s12), 0  ;;  %s1018_s17 = scalar_lea.sflag [#allocation8], %s1664_s25 }
 0x61b   : > { %s1176_s0 = sshll.u32 %s1682_s12, 7  ;;  %s1280_s20 = scalar_lea.vmem %s1592_s24, 128 }
 0x61c   : > { %s1035_s26 = scalar_lea.hbm %s1652_s9, %s1176_s0  ;;  %p1281_p12 = scmp.ne.s32.totalorder %s1592_s24, %s1280_s20 }
 0x61d   : > { %s1383_s13 = smov [#allocation7]  }
 0x61e   : > { %p1282_p13 = pnand %p1281_p12, %p1489_p7  ;;  %s1284_s29 = sshll.u32 %s1383_s13, 4  ;;  %s1285_s29 = int_to_ptr.vmem [resolvable:$false] %s1284_s29 }
 0x61f   : > { %s1286_s21 = scalar_lea.vmem %s1285_s29, 256  ;;  %p1287_p1 = scmp.lt.s32.totalorder %s1592_s24, %s1285_s29 }
 0x620   : > { %p1283_p0 = pneg %p1282_p13  ;;  %p1288_p2 = scmp.lt.s32.totalorder %s1286_s21, %s1280_s20 }
 0x622   : > { %p1289_p3 = por %p1288_p2, %p1287_p1 }
 0x624   : > { %p1290_p4 = pnand %p1289_p3, %p1283_p0 }
 0x626   : > { %1293 = shalt.err (!%p1290_p4)
}
 0x627   : > { %s1294_s12 = scalar_lea.hbm %s1035_s26, 128  ;;  %s1298_s28 = scalar_lea.hbm %s1652_s9, 256 }
 0x628   : > { %p1295_p5 = scmp.ne.s32.totalorder %s1035_s26, %s1294_s12  ;;  %p1299_p10 = scmp.lt.u32.totalorder %s1035_s26, %s1652_s9 }
 0x629   : > { %p1300_p11 = scmp.lt.u32.totalorder %s1298_s28, %s1294_s12  ;;  %p1302_p13 = scmp.lt.u32.totalorder %s1294_s12, %s1035_s26 }
 0x62a   : > { %p1296_p6 = pnand %p1295_p5, %p1489_p7 }
 0x62b   : > { %p1301_p12 = por %p1300_p11, %p1299_p10 }
 0x62c   : > { %p1297_p9 = pneg %p1296_p6 }
 0x62d   : > { %p1303_p1 = por %p1302_p13, %p1301_p12 }
 0x62f   : > { %p1304_p0 = pnand %p1303_p1, %p1297_p9 }
 0x631   : > { %1307 = shalt.err (!%p1304_p0)
}
 0x632   : > { %1191 = dma.vmem_to_hbm [thread:$0]  (%p1489_p7), %s1592_s24, 128, %s1035_s26, %s1018_s17  }
 0x633 PF: > { %p1197_p2 = scmp.ge.s32.totalorder %s1374_s16, 2  ;;  %s1049_s20 = sand.u32 1, %s1346_s30  }
 0x634   : > { %s1050_s1 = scalar_lea.sflag [#allocation8], %s1049_s20 }
 0x635   : > { %p1194_p3 = pnand %p1197_p2, %p1493_p8 }
 0x637   : > { %1341 = dma.done.wait (!%p1194_p3), %s1050_s1, 128  }
 0x638   : > { %1343 = vsyncadd (!%p1194_p3), %s1050_s1, 4294967168  ;;  %s22_s16 = sadd.s32 1, %s1374_s16   ;;  %s1665_s22 = sld [smem:[#allocation10_spill]] }
 0x639   : > { %p19_p4 = scmp.ge.s32.totalorder %s22_s16, 8   ;;  %s1666_s30 = smov %s1350_s10 }
 0x63a   : > { %s1667_s10 = smov %s1354_s11  ;;  %s1668_s11 = smov %s1503_s27 }
 0x63b   : > { %s1669_s12 = smov %s1366_s14  ;;  %s1670_s13 = smov %s1370_s15 }
 0x63c   : > { %s1671_s14 = smov %s1674_s18  ;;  %21 = sbr.rel (!%p19_p4) target bundleno = 8 (0x8), region = 118 }
 0x63e   : > { %s1672_s15 = smov %s1665_s22 }
 0x643   :  { %1055 = vsyncpa [#allocation8], 1 }
 0x644   :  { %1057 = vsyncpa [#allocation8 + $0x1], 1 }

</bundles_post_ra>
